<compile_context>
chip_gen: v7x
topology: tpu7x:2x2x1
jax: 0.10.0
libtpu: 0.0.40
codegen_flags: <defaults>
</compile_context>

<pallas_src>
import functools
import math

import jax
import jax.numpy as jnp
from jax.experimental import pallas as pl
from jax.experimental.pallas import tpu as pltpu


# ----------------------------------------------------------------------------
# Pallas kernels
# ----------------------------------------------------------------------------
def _online_softmax_update(a, i, m_ref, s_ref, *, hw, tile):
    """Accumulate per-row running max and sum(exp) of `a` across HW tiles."""
    if hw % tile != 0:
        # mask out-of-bounds columns of the (padded) last tile
        col = jax.lax.broadcasted_iota(jnp.int32, a.shape, 1) + i * tile
        a = jnp.where(col < hw, a, -jnp.inf)

    @pl.when(i == 0)
    def _():
        m_ref[...] = jnp.full_like(m_ref, -jnp.inf)
        s_ref[...] = jnp.zeros_like(s_ref)

    m_old = m_ref[...]
    m_new = jnp.maximum(m_old, jnp.max(a, axis=1, keepdims=True))
    s_ref[...] = (s_ref[...] * jnp.exp(m_old - m_new)
                  + jnp.sum(jnp.exp(a - m_new), axis=1, keepdims=True))
    m_ref[...] = m_new


def _stats_from_x_kernel(x_ref, w2_ref, m_ref, s_ref, *, hw, tile):
    """Pass 1 (internal branch): a = relu(net2(x_tile)), accumulate softmax stats."""
    i = pl.program_id(0)
    a = jnp.maximum(
        jnp.dot(w2_ref[...], x_ref[...], preferred_element_type=jnp.float32), 0.0)
    _online_softmax_update(a, i, m_ref, s_ref, hw=hw, tile=tile)


def _stats_from_ab_kernel(ab_ref, m_ref, s_ref, *, hw, tile):
    """Pass 1 (external-abundance branch): stats of the user-supplied matrix."""
    i = pl.program_id(0)
    _online_softmax_update(ab_ref[...], i, m_ref, s_ref, hw=hw, tile=tile)


def _main_kernel(x_ref, w12_ref, em_ref, m_ref, s_ref, out_ref, abund_ref):
    """Pass 2 (internal branch): fused net1+net2 matmul, normalize, mix, clamp."""
    band = out_ref.shape[0]
    # single fused matmul: both 1x1 convs consume the same x tile
    r = jnp.dot(w12_ref[...], x_ref[...], preferred_element_type=jnp.float32)
    out1 = r[:band]                                    # net1(x)
    a = jnp.maximum(r[band:], 0.0)                     # relu(net2(x))
    inv_s = pl.reciprocal(s_ref[...], approx=True)     # EUP slot, ~free
    abund = jnp.exp(a - m_ref[...]) * inv_s            # softmax over HW axis
    abund_ref[...] = abund
    out2 = jnp.dot(em_ref[...], abund, preferred_element_type=jnp.float32)
    out_ref[...] = jnp.clip(out1 + out2, 0.0, 1.0)


def _main_ext_kernel(x_ref, w1_ref, em_ref, ab_ref, m_ref, s_ref,
                     out_ref, abund_ref):
    """Pass 2 (external branch): out1 = net1(x), abundance from external matrix."""
    out1 = jnp.dot(w1_ref[...], x_ref[...], preferred_element_type=jnp.float32)
    inv_s = pl.reciprocal(s_ref[...], approx=True)
    abund = jnp.exp(ab_ref[...] - m_ref[...]) * inv_s
    abund_ref[...] = abund
    out2 = jnp.dot(em_ref[...], abund, preferred_element_type=jnp.float32)
    out_ref[...] = jnp.clip(out1 + out2, 0.0, 1.0)


# ----------------------------------------------------------------------------
# Glue: parameter setup + wrapper
# ----------------------------------------------------------------------------
def bilinear_tf(para, flag=True):
    """input_tf: (band, C1, 1, 1) weight -> (band, C1*(C1+1)//2) bilinear endmembers."""
    band, c1 = para.shape[0], para.shape[1]
    p = para.reshape(band, c1)
    iu, ju = jnp.triu_indices(c1)
    return (p[:, iu] * p[:, ju]).reshape(band, c1 * (c1 + 1) // 2)


class S2Img2StreamPallas:
    def __init__(self, input_c1, input_tf, output_c, key, hw_tile=8192):
        self.c1 = input_c1
        self.band = output_c
        self.c2 = input_c1 * (input_c1 + 1) // 2
        self.tf = input_tf
        self.hw_tile = hw_tile
        k1, k2 = jax.random.split(key)
        # Conv2d default init: kaiming_uniform(a=sqrt(5)) -> U(-1/sqrt(fan_in), +)
        b = 1.0 / math.sqrt(input_c1)
        self.w1 = jax.random.uniform(k1, (output_c, input_c1), jnp.float32, -b, b)
        self.w2 = jax.random.uniform(k2, (self.c2, input_c1), jnp.float32, -b, b)

    def _endmember(self):
        para = jnp.maximum(self.w1, 0.0)                         # relu(net1 weight)
        em = self.tf(para.reshape(self.band, self.c1, 1, 1), True)
        return jnp.maximum(em.reshape(self.band, self.c2), 0.0)  # relu

    def _tile(self, hw):
        t = min(self.hw_tile, hw)
        if t < hw:
            t = max(128, (t // 128) * 128)     # lane-dense output blocks
        return t

    def __call__(self, x1, abund_bmm=None):
        # x1: (1, C1, H, W) NCHW, float32
        n, c1, h, w = x1.shape
        assert n == 1 and c1 == self.c1, "module semantics require batch 1"
        hw = h * w
        band, c2 = self.band, self.c2
        x_flat = x1.reshape(c1, hw).astype(jnp.float32)
        em = self._endmember()

        tile = self._tile(hw)
        grid = (pl.cdiv(hw, tile),)

        stat_specs = [pl.BlockSpec((c2, 1), lambda i: (0, 0)),
                      pl.BlockSpec((c2, 1), lambda i: (0, 0))]
        stat_shapes = [jax.ShapeDtypeStruct((c2, 1), jnp.float32),
                       jax.ShapeDtypeStruct((c2, 1), jnp.float32)]
        main_out_specs = [pl.BlockSpec((band, tile), lambda i: (0, i)),
                          pl.BlockSpec((c2, tile), lambda i: (0, i))]
        main_out_shapes = [jax.ShapeDtypeStruct((band, hw), jnp.float32),
                           jax.ShapeDtypeStruct((c2, hw), jnp.float32)]
        # TODO(synk): outputs kept in f32 to match the PyTorch module exactly;
        # bf16 out/abund would cut ~40% of HBM writeback if downstream allows.

        if abund_bmm is None:
            # ---- pass 1: sequential online-softmax statistics over HW ----
            m, s = pl.pallas_call(
                functools.partial(_stats_from_x_kernel, hw=hw, tile=tile),
                grid=grid,
                in_specs=[pl.BlockSpec((c1, tile), lambda i: (0, i)),
                          pl.BlockSpec((c2, c1), lambda i: (0, 0))],
                out_specs=stat_specs,
                out_shape=stat_shapes,
                compiler_params=pltpu.CompilerParams(
                    dimension_semantics=("arbitrary",)),
                cost_estimate=pl.CostEstimate(
                    flops=2 * c2 * c1 * hw + 4 * c2 * hw,
                    transcendentals=c2 * hw,
                    bytes_accessed=4 * (c1 * hw + c2 * c1 + 2 * c2)),
            )(x_flat, self.w2)

            # ---- pass 2: per-tile independent compute (megacore parallel) ----
            w12 = jnp.concatenate([self.w1, self.w2], axis=0)   # fused net1+net2
            out_flat, abund = pl.pallas_call(
                _main_kernel,
                grid=grid,
                in_specs=[pl.BlockSpec((c1, tile), lambda i: (0, i)),
                          pl.BlockSpec((band + c2, c1), lambda i: (0, 0)),
                          pl.BlockSpec((band, c2), lambda i: (0, 0)),
                          pl.BlockSpec((c2, 1), lambda i: (0, 0)),
                          pl.BlockSpec((c2, 1), lambda i: (0, 0))],
                out_specs=main_out_specs,
                out_shape=main_out_shapes,
                compiler_params=pltpu.CompilerParams(
                    dimension_semantics=("parallel",)),
                cost_estimate=pl.CostEstimate(
                    flops=2 * (band + c2) * c1 * hw + 2 * band * c2 * hw,
                    transcendentals=c2 * hw,
                    bytes_accessed=4 * ((c1 + band + c2) * hw
                                        + (band + c2) * c1 + band * c2 + 2 * c2)),
            )(x_flat, w12, em, m, s)
        else:
            c2_ext, x_sz = abund_bmm.shape
            assert c2_ext == c2 and x_sz == hw
            ab = abund_bmm.astype(jnp.float32)

            m, s = pl.pallas_call(
                functools.partial(_stats_from_ab_kernel, hw=hw, tile=tile),
                grid=grid,
                in_specs=[pl.BlockSpec((c2, tile), lambda i: (0, i))],
                out_specs=stat_specs,
                out_shape=stat_shapes,
                compiler_params=pltpu.CompilerParams(
                    dimension_semantics=("arbitrary",)),
                cost_estimate=pl.CostEstimate(
                    flops=4 * c2 * hw,
                    transcendentals=c2 * hw,
                    bytes_accessed=4 * (c2 * hw + 2 * c2)),
            )(ab)

            out_flat, abund = pl.pallas_call(
                _main_ext_kernel,
                grid=grid,
                in_specs=[pl.BlockSpec((c1, tile), lambda i: (0, i)),
                          pl.BlockSpec((band, c1), lambda i: (0, 0)),
                          pl.BlockSpec((band, c2), lambda i: (0, 0)),
                          pl.BlockSpec((c2, tile), lambda i: (0, i)),
                          pl.BlockSpec((c2, 1), lambda i: (0, 0)),
                          pl.BlockSpec((c2, 1), lambda i: (0, 0))],
                out_specs=main_out_specs,
                out_shape=main_out_shapes,
                compiler_params=pltpu.CompilerParams(
                    dimension_semantics=("parallel",)),
                cost_estimate=pl.CostEstimate(
                    flops=2 * band * c1 * hw + 2 * band * c2 * hw,
                    transcendentals=c2 * hw,
                    bytes_accessed=4 * ((c1 + band + 2 * c2) * hw
                                        + band * c1 + band * c2 + 2 * c2)),
            )(x_flat, self.w1, em, ab, m, s)

        out = out_flat.reshape(1, band, h, w)
        return out, abund


# ----------------------------------------------------------------------------
# Pure-JAX references (sanity check of the kernels)
# ----------------------------------------------------------------------------
def _reference_internal(model, x1):
    c1, h, w = x1.shape[1], x1.shape[2], x1.shape[3]
    xf = x1.reshape(c1, h * w)
    out1 = jnp.dot(model.w1, xf, precision="highest")
    a = jnp.maximum(jnp.dot(model.w2, xf, precision="highest"), 0.0)
    abund = jax.nn.softmax(a, axis=1)
    em = model._endmember()
    out2 = jnp.dot(em, abund, precision="highest")
    return jnp.clip(out1 + out2, 0.0, 1.0).reshape(1, model.band, h, w), abund


def _reference_external(model, x1, abund_ext):
    c1, h, w = x1.shape[1], x1.shape[2], x1.shape[3]
    xf = x1.reshape(c1, h * w)
    out1 = jnp.dot(model.w1, xf, precision="highest")
    abund = jax.nn.softmax(abund_ext, axis=1)
    em = model._endmember()
    out2 = jnp.dot(em, abund, precision="highest")
    return jnp.clip(out1 + out2, 0.0, 1.0).reshape(1, model.band, h, w), abund


if __name__ == "__main__":
    key = jax.random.PRNGKey(0)
    k_param, k_x, k_ab = jax.random.split(key, 3)

    input_c1, output_c = 4, 8
    H = W = 32                              # hw = 1024
    # small hw_tile so the multi-tile / online-softmax path is actually exercised
    model = S2Img2StreamPallas(input_c1, bilinear_tf, output_c, k_param,
                               hw_tile=256)

    x1 = jax.random.uniform(k_x, (1, input_c1, H, W), jnp.float32)

    # branch 1: abund_bmm is None (abundance computed inside the kernels)
    out, abund = model(x1, None)
    out, abund = jax.block_until_ready(out), jax.block_until_ready(abund)
    ref_out, ref_abund = _reference_internal(model, x1)
    assert out.shape == (1, output_c, H, W)
    assert abund.shape == (model.c2, H * W)
    assert jnp.allclose(out, ref_out, atol=1e-2), "internal: output mismatch"
    assert jnp.allclose(abund, ref_abund, atol=1e-3), "internal: abundance mismatch"

    # branch 2: external abundance matrix
    abund_ext = jax.random.normal(k_ab, (model.c2, H * W), jnp.float32)
    out2_, abund2_ = model(x1, abund_ext)
    out2_, abund2_ = jax.block_until_ready(out2_), jax.block_until_ready(abund2_)
    ref_out2, ref_abund2 = _reference_external(model, x1, abund_ext)
    assert jnp.allclose(out2_, ref_out2, atol=1e-2), "external: output mismatch"
    assert jnp.allclose(abund2_, ref_abund2, atol=1e-3), "external: abundance mismatch"

    print("KERNEL_OK")
</pallas_src>

<mosaic_0001>
module attributes {stable_mosaic.version = 11 : i64} {
  func.func @_stats_from_x_kernel(%arg0: i32, %arg1: memref<4x256xf32, #tpu.memory_space<vmem>>, %arg2: memref<10x4xf32, #tpu.memory_space<vmem>>, %arg3: memref<10x1xf32, #tpu.memory_space<vmem>>, %arg4: memref<10x1xf32, #tpu.memory_space<vmem>>) attributes {dimension_semantics = [#tpu.dimension_semantics<arbitrary>], iteration_bounds = array<i64: 4>, scalar_prefetch = 0 : i64, scratch_operands = 0 : i64, tpu.core_type = #tpu.core_type<tc>, window_params = [{transform_indices = @transform_0, window_bounds = array<i64: 4, 256>}, {pipeline_mode = #tpu.pipeline_mode<synchronous>, transform_indices = @transform_1, window_bounds = array<i64: 10, 4>}, {pipeline_mode = #tpu.pipeline_mode<synchronous>, transform_indices = @transform_2, window_bounds = array<i64: 10, 1>}, {pipeline_mode = #tpu.pipeline_mode<synchronous>, transform_indices = @transform_3, window_bounds = array<i64: 10, 1>}]} {
    %c0 = arith.constant 0 : index
    %c0_0 = arith.constant 0 : index
    %0 = vector.load %arg2[%c0, %c0_0] : memref<10x4xf32, #tpu.memory_space<vmem>>, vector<10x4xf32>
    %c0_1 = arith.constant 0 : index
    %c0_2 = arith.constant 0 : index
    %1 = vector.load %arg1[%c0_1, %c0_2] : memref<4x256xf32, #tpu.memory_space<vmem>>, vector<4x256xf32>
    %cst = arith.constant dense<0.000000e+00> : vector<10x256xf32>
    %2 = tpu.matmul %0, %1, %cst {dimension_numbers = #tpu.dot_dimension_numbers<[1], [0], [0], [1], [0, 0, 1, 1], [], []>} : vector<10x4xf32>, vector<4x256xf32>, vector<10x256xf32> -> vector<10x256xf32>
    %cst_3 = arith.constant 0.000000e+00 : f32
    %3 = vector.broadcast %cst_3 : f32 to vector<10x256xf32>
    %4 = arith.maximumf %2, %3 : vector<10x256xf32>
    %c0_i32 = arith.constant 0 : i32
    %5 = arith.cmpi eq, %arg0, %c0_i32 : i32
    %6 = arith.extui %5 : i1 to i32
    %c0_i32_4 = arith.constant 0 : i32
    %7 = arith.cmpi ne, %6, %c0_i32_4 : i32
    scf.if %7 {
      %cst_15 = arith.constant 0xFF800000 : f32
      %24 = vector.broadcast %cst_15 : f32 to vector<10x1xf32>
      %c0_16 = arith.constant 0 : index
      %c0_17 = arith.constant 0 : index
      %25 = vector.load %arg3[%c0_16, %c0_17] : memref<10x1xf32, #tpu.memory_space<vmem>>, vector<10x1xf32>
      tpu.vector_store %arg3[%c0_16, %c0_17], %24 {strides = array<i32>} : memref<10x1xf32, #tpu.memory_space<vmem>>, vector<10x1xf32>,
      %cst_18 = arith.constant 0.000000e+00 : f32
      %26 = vector.broadcast %cst_18 : f32 to vector<10x1xf32>
      %c0_19 = arith.constant 0 : index
      %c0_20 = arith.constant 0 : index
      %27 = vector.load %arg4[%c0_19, %c0_20] : memref<10x1xf32, #tpu.memory_space<vmem>>, vector<10x1xf32>
      tpu.vector_store %arg4[%c0_19, %c0_20], %26 {strides = array<i32>} : memref<10x1xf32, #tpu.memory_space<vmem>>, vector<10x1xf32>,
    } else {
    }
    %c0_5 = arith.constant 0 : index
    %c0_6 = arith.constant 0 : index
    %8 = vector.load %arg3[%c0_5, %c0_6] : memref<10x1xf32, #tpu.memory_space<vmem>>, vector<10x1xf32>
    %cst_7 = arith.constant dense<0xFF800000> : vector<10xf32>
    %9 = vector.multi_reduction <maximumf>, %4, %cst_7 [1] : vector<10x256xf32> to vector<10xf32>
    %10 = vector.shape_cast %9 : vector<10xf32> to vector<10x1xf32>
    %11 = arith.maximumf %8, %10 : vector<10x1xf32>
    %c0_8 = arith.constant 0 : index
    %c0_9 = arith.constant 0 : index
    %12 = vector.load %arg4[%c0_8, %c0_9] : memref<10x1xf32, #tpu.memory_space<vmem>>, vector<10x1xf32>
    %13 = arith.subf %8, %11 : vector<10x1xf32>
    %14 = math.exp %13 : vector<10x1xf32>
    %15 = arith.mulf %12, %14 : vector<10x1xf32>
    %16 = vector.broadcast %11 : vector<10x1xf32> to vector<10x256xf32>
    %17 = arith.subf %4, %16 : vector<10x256xf32>
    %18 = math.exp %17 : vector<10x256xf32>
    %cst_10 = arith.constant dense<0.000000e+00> : vector<10xf32>
    %19 = vector.multi_reduction <add>, %18, %cst_10 [1] : vector<10x256xf32> to vector<10xf32>
    %20 = vector.shape_cast %19 : vector<10xf32> to vector<10x1xf32>
    %21 = arith.addf %15, %20 : vector<10x1xf32>
    %c0_11 = arith.constant 0 : index
    %c0_12 = arith.constant 0 : index
    %22 = vector.load %arg4[%c0_11, %c0_12] : memref<10x1xf32, #tpu.memory_space<vmem>>, vector<10x1xf32>
    tpu.vector_store %arg4[%c0_11, %c0_12], %21 {strides = array<i32>} : memref<10x1xf32, #tpu.memory_space<vmem>>, vector<10x1xf32>,
    %c0_13 = arith.constant 0 : index
    %c0_14 = arith.constant 0 : index
    %23 = vector.load %arg3[%c0_13, %c0_14] : memref<10x1xf32, #tpu.memory_space<vmem>>, vector<10x1xf32>
    tpu.vector_store %arg3[%c0_13, %c0_14], %11 {strides = array<i32>} : memref<10x1xf32, #tpu.memory_space<vmem>>, vector<10x1xf32>,
    return
  }
  func.func @transform_0(%arg0: i32) -> (i32, i32) {
    %c0_i32 = arith.constant 0 : i32
    %c0_i32_0 = arith.constant 0 : i32
    return %c0_i32, %arg0 : i32, i32
  }
  func.func @transform_1(%arg0: i32) -> (i32, i32) {
    %c0_i32 = arith.constant 0 : i32
    %c0_i32_0 = arith.constant 0 : i32
    %c0_i32_1 = arith.constant 0 : i32
    return %c0_i32, %c0_i32_0 : i32, i32
  }
  func.func @transform_2(%arg0: i32) -> (i32, i32) {
    %c0_i32 = arith.constant 0 : i32
    %c0_i32_0 = arith.constant 0 : i32
    %c0_i32_1 = arith.constant 0 : i32
    return %c0_i32, %c0_i32_0 : i32, i32
  }
  func.func @transform_3(%arg0: i32) -> (i32, i32) {
    %c0_i32 = arith.constant 0 : i32
    %c0_i32_0 = arith.constant 0 : i32
    %c0_i32_1 = arith.constant 0 : i32
    return %c0_i32, %c0_i32_0 : i32, i32
  }
}

</mosaic_0001>

<bundles_post_ra>
// kernel: tpu_custom_call.1
= control target key start
LH: loop header
LB: loop body
LE: loop exit
PB: predicated region body
PF: predicated region fallthrough
CT: control target
= control target key end

     0   :  { %9 = vsyncpa [#allocation3], 0  ;;  %s707_s0 = inlined_call_operand.hbm [shape: f32[4,1024], index: 0, kind: input, shape index: {}]   ;;  %s708_s1 = inlined_call_operand.vmem [shape: f32[10,4], index: 1, kind: input, shape index: {}]   ;;  %s709_s2 = inlined_call_operand.vmem [shape: f32[10,1], index: 2, kind: output, shape index: {0}]   ;;  %s710_s3 = inlined_call_operand.vmem [shape: f32[10,1], index: 3, kind: output, shape index: {1}]  }
   0x1   :  { %11 = vsyncpa [#allocation3 + $0x1], 0  ;;  %s554_s12 = smov 0   ;;  %s556_s13 = smov 0  }
   0x2   :  { %s558_s14 = smov 0   ;;  %s560_s15 = smov 0  }
   0x3 LB: > { %s387_s16 = sadd.s32 4294967295, %s527_s15   ;;  %s574_s17 = sadd.s32 1, %s527_s15   ;;  %s527_s15 = sphi %s560_s15, %s718_s15   ;;  %s523_s14 = sphi %s558_s14, %s717_s14   ;;  %s519_s13 = sphi %s556_s13, %s716_s13   ;;  %s515_s12 = sphi %s554_s12, %s715_s12  }
   0x4   : > { %s21_s18 = ssub.s32 %s527_s15, %s574_s17  ;;  %s24_s19 = sadd.s32 1, %s523_s14 }
   0x5   : > { %p22_p0 = scmp.eq.s32.totalorder %s21_s18, 0  ;;  %p31_p1 = scmp.ne.s32.totalorder %s523_s14, %s519_s13 }
   0x6   : > { %p32_p2 = scmp.eq.s32.totalorder %s527_s15, 0  ;;  %p37_p3 = scmp.ne.s32.totalorder %s519_s13, %s515_s12 }
   0x7   : > { %s584_s20 = scalar_select %p22_p0, %s523_s14, %s24_s19  }
   0x8   : > { %p33_p4 = por %p32_p2, %p31_p1  ;;  %p38_p5 = scmp.eq.s32.totalorder %s387_s16, 0 }
   0x9   : > { %p411_p6 = scmp.lt.s32.totalorder %s527_s15, 4  ;;  %s127_s22 = sand.u32 1, %s523_s14  }
   0xa   : > { %p589_p7 = por %p38_p5, %p37_p3  ;;  %s390_s23 = sshll.u32 %s127_s22, 3 }
   0xb   : > { %s402_s24 = sshll.u32 %s527_s15, 7  ;;  %s131_s28 = scalar_lea.vmem [#allocation2], %s390_s23 }
   0xc   : > { %s598_s27 = scalar_lea.hbm %s707_s0, %s402_s24  ;;  %s139_s29 = sshll.u32 %s131_s28, 4  ;;  %s600_s29 = int_to_ptr.vmem [resolvable:$true] %s139_s29 }
   0xd   : > { %p602_p8 = pnand %p411_p6, %p33_p4  ;;  %s128_s4 = scalar_lea.sflag [#allocation3], %s127_s22 }
   0xe   : > { %s463_s5 = scalar_lea.hbm %s598_s27, 128  ;;  %s468_s8 = scalar_lea.hbm %s707_s0, 512 }
   0xf   : > { %p464_p11 = scmp.ne.s32.totalorder %s598_s27, %s463_s5  ;;  %p465_p12 = pneg %p602_p8 }
  0x10   : > { %p469_p1 = scmp.lt.u32.totalorder %s598_s27, %s707_s0  ;;  %p470_p2 = scmp.lt.u32.totalorder %s468_s8, %s463_s5 }
  0x11   : > { %p466_p13 = pnand %p465_p12, %p464_p11  ;;  %p472_p4 = scmp.lt.u32.totalorder %s463_s5, %s598_s27 }
  0x12   : > { %p471_p3 = por %p470_p2, %p469_p1 }
  0x13   : > { %p467_p0 = pneg %p466_p13 }
  0x14   : > { %p473_p5 = por %p472_p4, %p471_p3 }
  0x16   : > { %p474_p6 = pnand %p473_p5, %p467_p0 }
  0x18   : > { %477 = shalt.err (!%p474_p6)
}
  0x19   : > { %s478_s11 = scalar_lea.vmem %s600_s29, 128  ;;  %s529_s12 = smov [#allocation2]  }
  0x1a   : > { %p479_p11 = scmp.ne.s32.totalorder %s600_s29, %s478_s11  ;;  %s483_s18 = sshll.u32 %s529_s12, 4  ;;  %s484_s18 = int_to_ptr.vmem [resolvable:$false] %s483_s18 }
  0x1b   : > { %s485_s19 = scalar_lea.vmem %s484_s18, 256  ;;  %p486_p10 = scmp.lt.s32.totalorder %s600_s29, %s484_s18 }
  0x1c   : > { %p481_p13 = pnand %p479_p11, %p465_p12  ;;  %p487_p1 = scmp.lt.s32.totalorder %s485_s19, %s478_s11 }
  0x1e   : > { %p482_p9 = pneg %p481_p13  ;;  %p488_p2 = por %p487_p1, %p486_p10 }
  0x20   : > { %p489_p3 = pnand %p488_p2, %p482_p9 }
  0x22   : > { %492 = shalt.err (!%p489_p3)
}
  0x23   : > { %410 = dma.hbm_to_vmem [thread:$0]  (!%p602_p8), %s598_s27, 128, %s600_s29, %s128_s4  }
  0x24   : > { %p713_p0 = scmp.lt.s32.totalorder %s527_s15, 5  ;;  %p714_p4 = scmp.ge.s32.totalorder %s527_s15, 1 }
  0x26   : > { %p145_p12 = pnand %p714_p4, %p713_p0 }
  0x27   : > { %s150_s22 = sand.u32 (!%p145_p12), 1, %s519_s13  }
  0x28   : > { %148 = sbr.rel (%p145_p12) target bundleno = 710 (0x2c6), region = 28  ;;  %s394_s23 = sshll.u32 (!%p145_p12), %s150_s22, 3 }
  0x29   : > { %s151_s24 = scalar_lea.sflag (!%p145_p12), [#allocation3], %s150_s22  ;;  %s154_s25 = scalar_lea.vmem (!%p145_p12), [#allocation2], %s394_s23 }
  0x2f   : > { %510 = dma.done.wait (%p589_p7), %s151_s24, 128  }
  0x30   : > { %512 = vsyncadd (%p589_p7), %s151_s24, 4294967168  ;;  %v530_v0 = vmov 0.0   ;;  %v175_v1 = vld [vmem:[%s154_s25] sm:$0xff]  ;;  %vm185_vm0 = vcmask 1043456   ;;  %vm178_vm1 = vcmask 31744   ;;  %p399_p7 = scmp.ne.s32.totalorder %s387_s16, 0 }
  0x31   : > { %254 = vmatprep.mubr.f32.mxu0 %v530_v0  ;;  %260 = vmatprep.mubr.f32.mxu1 %v530_v0  ;;  %v177_v2 = vcombine.high %v175_v1, %v175_v1  ;;  %v173_v3 = vld [vmem:[%s708_s1] sm:$0xff]  ;;  %v174_v4 = vld [vmem:[%s708_s1 + $0x8] sm:$0x3]  ;;  %vm275_vm2 = vcmask (!%p399_p7), 7168   ;;  %vm277_vm3 = vcmask (!%p399_p7), 1024   ;;  %v531_v13 = vmov (!%p399_p7), -inf  }
  0x32   : > { %276 = vst.msk [vmem:[%s709_s2] sm:$0xff] (!%p399_p7), %vm275_vm2, %v531_v13  ;;  %v532_v14 = vmov (!%p399_p7), 0.0  }
  0x33   : > { %395 = vmatprep.subr.msk.mxu0 %vm185_vm0, %v177_v2  ;;  %403 = vmatprep.subr.msk.mxu1 %vm185_vm0, %v177_v2  ;;  %278 = vst.msk [vmem:[%s709_s2 + $0x8] sm:$0x3] (!%p399_p7), %vm277_vm3, %v531_v13  ;;  %280 = vst.msk [vmem:[%s710_s3 + $0x8] sm:$0x3] (!%p399_p7), %vm277_vm3, %v532_v14 }
  0x34   : > { %396 = vmatpush1.msk.msra.mxu0 %vm185_vm0, %v175_v1  ;;  %404 = vmatpush1.msk.msra.mxu1 %vm185_vm0, %v175_v1  ;;  %279 = vst.msk [vmem:[%s710_s3] sm:$0xff] (!%p399_p7), %vm275_vm2, %v532_v14 }
  0x35   : > { %397 = vmatmul.mubr.msk.f32.vlgmr.msra.gmra.mrb[0].mxu0 %vm178_vm1, %v173_v3  ;;  %398 = vmatmul.mubr.msk.f32.vlgmr.msra.gmra.mrb[0].mxu1 %vm178_vm1, %v174_v4 }
 0x104   : > { %274 = sbr.rel (%p399_p7) target bundleno = 267 (0x10b), region = 36 }
 0x108   : > { %v256_v5 = vpop.f32.mrb[0].mxu0  ;;  %v262_v6 = vpop.f32.mrb[0].mxu1 }
 0x109   : > { %v267_v7 = vmax.f32 %v256_v5, 0.0  ;;  %v269_v8 = vmax.f32 %v262_v6, 0.0  ;;  %v258_v9 = vpop.f32.mrb[1].mxu0  ;;  %v264_v10 = vpop.f32.mrb[1].mxu1 }
 0x10a   : > { %v268_v11 = vmax.f32 %v258_v9, 0.0  ;;  %v270_v12 = vmax.f32 %v264_v10, 0.0 }
 0x10b PF: > { %vm286_vm4 = vcmask 1041408   ;;  %v533_v19 = vmov 0   ;;  %v282_v20 = vld [vmem:[%s709_s2 + $0x8] sm:$0x3]  ;;  %vm338_vm5 = vcmask 1024   ;;  %v281_v23 = vld [vmem:[%s709_s2] sm:$0xff] }
 0x10c   : > { %v287_v15 = vsel %vm286_vm4, %v269_v8, -inf  ;;  %v288_v16 = vsel %vm286_vm4, %v270_v12, -inf  ;;  %v283_v18 = vmax.f32 %v267_v7, %v268_v11  ;;  %449 = vset.pattern.permute.xlu1 %v533_v19  ;;  %450 = vset.pattern.permute.xlu0 %v533_v19  ;;  %vm336_vm6 = vcmask 7168   ;;  %v295_v49 = vld [vmem:[%s710_s3 + $0x8] sm:$0x3]  ;;  %v294_v52 = vld [vmem:[%s710_s3] sm:$0xff] }
 0x10d   : > { %v289_v17 = vmax.f32 %v287_v15, %v288_v16 }
 0x10f   : > { %290 = vmax.xlane.f32.xlu0 %v289_v17 }
 0x113   : > { %284 = vmax.xlane.f32.xlu0 %v283_v18 }
 0x19c   : > { %v291_v21 = vpop.xlane.xlu0 %290 }
 0x19d   : > { %v293_v22 = vmax.f32 %v282_v20, %v291_v21 }
 0x19f   : > { %v297_v24 = vsub.f32 %v282_v20, %v293_v22  ;;  %341 = vst.msk [vmem:[%s709_s2 + $0x8] sm:$0x3] %vm338_vm5, %v293_v22  ;;  %311 = vperm.xlu1 %449, %v293_v22  }
 0x1a0   : > { %v285_v25 = vpop.xlane.xlu0 %284 }
 0x1a1   : > { %v292_v26 = vmax.f32 %v281_v23, %v285_v25  ;;  %v300_v46 = vmul.f32 1.442695, %v297_v24 }
 0x1a3   : > { %v296_v27 = vsub.f32 %v281_v23, %v292_v26  ;;  %340 = vst.msk [vmem:[%s709_s2] sm:$0xff] %vm336_vm6, %v292_v26  ;;  %306 = vperm.xlu1 %449, %v292_v26  }
 0x1a5   : > { %v298_v47 = vmul.f32 1.442695, %v296_v27 }
 0x21e   : > { %v312_v28 = vpop.permute.xlu1 %311 }
 0x21f   : > { %v316_v29 = vsub.f32 %v269_v8, %v312_v28  ;;  %v317_v30 = vsub.f32 %v270_v12, %v312_v28 }
 0x221   : > { %v322_v31 = vmul.f32 1.442695, %v316_v29  ;;  %v324_v32 = vmul.f32 1.442695, %v317_v30 }
 0x222   : > { %v307_v33 = vpop.permute.xlu1 %306 }
 0x223   : > { %451 = vpow2.f32 %v322_v31  ;;  %v314_v34 = vsub.f32 %v267_v7, %v307_v33  ;;  %v315_v35 = vsub.f32 %v268_v11, %v307_v33 }
 0x224   : > { %453 = vpow2.f32 %v324_v32 }
 0x225   : > { %v318_v36 = vmul.f32 1.442695, %v314_v34  ;;  %v320_v37 = vmul.f32 1.442695, %v315_v35 }
 0x227   : > { %455 = vpow2.f32 %v318_v36 }
 0x228   : > { %457 = vpow2.f32 %v320_v37 }
 0x229   : > { %459 = vpow2.f32 %v300_v46 }
 0x22a   : > { %461 = vpow2.f32 %v298_v47 }
 0x22d   : > { %v452_v38 = vpop.eup %451 }
 0x22e   : > { %v454_v39 = vpop.eup %453  ;;  %v329_v40 = vsel %vm286_vm4, %v452_v38, 0.0 }
 0x22f   : > { %v330_v41 = vsel %vm286_vm4, %v454_v39, 0.0 }
 0x230   : > { %v331_v42 = vadd.f32 %v330_v41, %v329_v40 }
 0x231   : > { %v456_v43 = vpop.eup %455 }
 0x232   : > { %v458_v44 = vpop.eup %457  ;;  %332 = vadd.xlane.f32.xlu1 %v331_v42 }
 0x233   : > { %v326_v45 = vadd.f32 %v458_v44, %v456_v43  ;;  %v460_v48 = vpop.eup %459 }
 0x234   : > { %v462_v50 = vpop.eup %461  ;;  %v303_v51 = vmul.f32 %v460_v48, %v295_v49 }
 0x235   : > { %327 = vadd.xlane.f32.xlu0 %v326_v45  ;;  %v302_v55 = vmul.f32 %v462_v50, %v294_v52 }
 0x2bf   : > { %v333_v53 = vpop.xlane.xlu1 %332 }
 0x2c0   : > { %v335_v54 = vadd.f32 %v333_v53, %v303_v51 }
 0x2c2   : > { %339 = vst.msk [vmem:[%s710_s3 + $0x8] sm:$0x3] %vm338_vm5, %v335_v54  ;;  %v328_v56 = vpop.xlane.xlu0 %327 }
 0x2c3   : > { %v334_v57 = vadd.f32 %v328_v56, %v302_v55 }
 0x2c5   : > { %337 = vst.msk [vmem:[%s710_s3] sm:$0xff] %vm336_vm6, %v334_v57 }
 0x2c6 PF: > { %p14_p8 = scmp.ge.s32.totalorder %s574_s17, 6   ;;  %s715_s12 = smov %s519_s13 }
 0x2c7   : > { %s716_s13 = smov %s523_s14  ;;  %s717_s14 = smov %s584_s20 }
 0x2c8   : > { %s718_s15 = smov %s574_s17  ;;  %16 = sbr.rel (!%p14_p8) target bundleno = 3 (0x3), region = 76 }
 0x2cf   :  { %359 = vsyncpa [#allocation3], 1 }
 0x2d0   :  { %361 = vsyncpa [#allocation3 + $0x1], 1 }

</bundles_post_ra>
